<compile_context>
chip_gen: v6e
topology: v6e:2x2x1
jax: 0.10.0
libtpu: 0.0.40
codegen_flags: <defaults>
</compile_context>

<pallas_src>
import functools
import math

import jax
import jax.numpy as jnp
import numpy as np
from jax import lax
from jax.experimental import pallas as pl
from jax.experimental.pallas import tpu as pltpu


# ----------------------------------------------------------------------------
# In-kernel math helpers
# ----------------------------------------------------------------------------
def _mish(x):
    # numerically stable mish: x * tanh(softplus(x))
    sp = jnp.maximum(x, 0.0) + jnp.log(1.0 + jnp.exp(-jnp.abs(x)))
    return x * jnp.tanh(sp)


def _sigmoid(x):
    return 1.0 / (1.0 + jnp.exp(-x))


# ----------------------------------------------------------------------------
# Kernels
# ----------------------------------------------------------------------------
def _dense_kernel(x_ref, w_ref, b_ref, o_ref, *, act, pre_act):
    x = x_ref[...].astype(jnp.float32)
    if pre_act == "mish":
        x = _mish(x)
    if x_ref.shape[-1] == 1:                       # degenerate K==1 "matmul"
        y = x * w_ref[...]
    else:
        y = jnp.dot(x, w_ref[...], preferred_element_type=jnp.float32)
    y = y + b_ref[...]
    if act == "mish":
        y = _mish(y)
    elif act == "tanh":
        y = jnp.tanh(y)
    elif act == "relu":
        y = jnp.maximum(y, 0.0)
    elif act == "softmax":
        y = y - jnp.max(y, axis=-1, keepdims=True)
        e = jnp.exp(y)
        y = e / jnp.sum(e, axis=-1, keepdims=True)
    o_ref[...] = y


def _layernorm_kernel(x_ref, g_ref, b_ref, o_ref, *, eps, pre_act):
    x = x_ref[...].astype(jnp.float32)
    if pre_act == "mish":
        x = _mish(x)
    mu = jnp.mean(x, axis=-1, keepdims=True)
    d = x - mu
    var = jnp.mean(d * d, axis=-1, keepdims=True)
    o_ref[...] = d * lax.rsqrt(var + eps) * g_ref[...] + b_ref[...]


def _mish_kernel(x_ref, o_ref):
    o_ref[...] = _mish(x_ref[...].astype(jnp.float32))


def _posenc_kernel(x_ref, pe_ref, o_ref, *, scale):
    o_ref[...] = x_ref[...] * scale + pe_ref[...]


def _attention_kernel(q_ref, k_ref, v_ref, o_ref, *, scale):
    q = q_ref[...].astype(jnp.float32)
    k = k_ref[...].astype(jnp.float32)
    v = v_ref[...].astype(jnp.float32)
    s = lax.dot_general(q, k, (((1,), (1,)), ((), ())),
                        preferred_element_type=jnp.float32) * scale
    s = s - jnp.max(s, axis=-1, keepdims=True)
    p = jnp.exp(s)
    p = p * pl.reciprocal(jnp.sum(p, axis=-1, keepdims=True), approx=True)
    o_ref[...] = jnp.dot(p, v, preferred_element_type=jnp.float32)


def _gru_kernel(xr_ref, xz_ref, xn_ref, whr_ref, whz_ref, whn_ref,
                bhr_ref, bhz_ref, bhn_ref, o_ref, h_scr):
    # PyTorch GRU cell (gates r, z, n); input projections are precomputed.
    whr = whr_ref[...]
    whz = whz_ref[...]
    whn = whn_ref[...]
    bhr = bhr_ref[...]
    bhz = bhz_ref[...]
    bhn = bhn_ref[...]
    h_scr[...] = jnp.zeros_like(h_scr)

    @pl.loop(0, o_ref.shape[0])
    def _(t):
        h = h_scr[...]                                            # (1, H)
        hr = jnp.dot(h, whr, preferred_element_type=jnp.float32) + bhr
        hz = jnp.dot(h, whz, preferred_element_type=jnp.float32) + bhz
        hn = jnp.dot(h, whn, preferred_element_type=jnp.float32) + bhn
        r = _sigmoid(xr_ref[pl.ds(t, 1), :] + hr)
        zg = _sigmoid(xz_ref[pl.ds(t, 1), :] + hz)
        n = jnp.tanh(xn_ref[pl.ds(t, 1), :] + r * hn)
        h_new = (1.0 - zg) * n + zg * h
        h_scr[...] = h_new
        o_ref[pl.ds(t, 1), :] = h_new


# ----------------------------------------------------------------------------
# Pallas wrappers
# ----------------------------------------------------------------------------
def _row_tiles(n):
    # Full-extent single block for small N; 256-row cdiv tiling for large N.
    if n <= 512:
        return n, 1
    return 256, pl.cdiv(n, 256)


def dense(x, p, act=None, pre_act=None):
    """y = act(pre_act(x) @ W + b) — fused Linear kernel (any leading dims)."""
    w, b = p["w"], p["b"]
    lead = x.shape[:-1]
    k = x.shape[-1]
    m = w.shape[1]
    x2 = x.reshape(-1, k).astype(jnp.float32)
    n = x2.shape[0]
    tr, steps = _row_tiles(n)
    kern = functools.partial(_dense_kernel, act=act, pre_act=pre_act)
    out = pl.pallas_call(
        kern,
        out_shape=jax.ShapeDtypeStruct((n, m), jnp.float32),
        grid_spec=pltpu.PrefetchScalarGridSpec(
            num_scalar_prefetch=0,
            grid=(steps,),
            in_specs=[pl.BlockSpec((tr, k), lambda i: (i, 0)),
                      pl.BlockSpec((k, m), lambda i: (0, 0)),
                      pl.BlockSpec((1, m), lambda i: (0, 0))],
            out_specs=pl.BlockSpec((tr, m), lambda i: (i, 0))),
        compiler_params=pltpu.CompilerParams(dimension_semantics=("parallel",)),
    )(x2, w, b)
    return out.reshape(*lead, m)


def layer_norm(x, p, pre_act=None, eps=1e-5):
    lead = x.shape[:-1]
    f = x.shape[-1]
    x2 = x.reshape(-1, f).astype(jnp.float32)
    n = x2.shape[0]
    tr, steps = _row_tiles(n)
    kern = functools.partial(_layernorm_kernel, eps=eps, pre_act=pre_act)
    out = pl.pallas_call(
        kern,
        out_shape=jax.ShapeDtypeStruct((n, f), jnp.float32),
        grid_spec=pltpu.PrefetchScalarGridSpec(
            num_scalar_prefetch=0,
            grid=(steps,),
            in_specs=[pl.BlockSpec((tr, f), lambda i: (i, 0)),
                      pl.BlockSpec((1, f), lambda i: (0, 0)),
                      pl.BlockSpec((1, f), lambda i: (0, 0))],
            out_specs=pl.BlockSpec((tr, f), lambda i: (i, 0))),
        compiler_params=pltpu.CompilerParams(dimension_semantics=("parallel",)),
    )(x2, p["g"], p["b"])
    return out.reshape(*lead, f)


def mish(x):
    lead = x.shape[:-1]
    f = x.shape[-1]
    x2 = x.reshape(-1, f).astype(jnp.float32)
    n = x2.shape[0]
    tr, steps = _row_tiles(n)
    out = pl.pallas_call(
        _mish_kernel,
        out_shape=jax.ShapeDtypeStruct((n, f), jnp.float32),
        grid_spec=pltpu.PrefetchScalarGridSpec(
            num_scalar_prefetch=0,
            grid=(steps,),
            in_specs=[pl.BlockSpec((tr, f), lambda i: (i, 0))],
            out_specs=pl.BlockSpec((tr, f), lambda i: (i, 0))),
        compiler_params=pltpu.CompilerParams(dimension_semantics=("parallel",)),
    )(x2)
    return out.reshape(*lead, f)


def positional_encode(x, pe, d_model):
    b, s, d = x.shape
    kern = functools.partial(_posenc_kernel, scale=math.sqrt(d_model))
    return pl.pallas_call(
        kern,
        out_shape=jax.ShapeDtypeStruct((b, s, d), jnp.float32),
        grid_spec=pltpu.PrefetchScalarGridSpec(
            num_scalar_prefetch=0,
            grid=(b,),
            in_specs=[pl.BlockSpec((None, s, d), lambda i: (i, 0, 0)),
                      pl.BlockSpec((s, d), lambda i: (0, 0))],
            out_specs=pl.BlockSpec((None, s, d), lambda i: (i, 0, 0))),
        compiler_params=pltpu.CompilerParams(dimension_semantics=("parallel",)),
    )(x.astype(jnp.float32), pe)


def attention_core(q, k, v):
    b, nh, s, dh = q.shape
    kern = functools.partial(_attention_kernel, scale=1.0 / math.sqrt(dh))
    spec = pl.BlockSpec((None, None, s, dh), lambda i, j: (i, j, 0, 0))
    return pl.pallas_call(
        kern,
        out_shape=jax.ShapeDtypeStruct((b, nh, s, dh), jnp.float32),
        grid_spec=pltpu.PrefetchScalarGridSpec(
            num_scalar_prefetch=0,
            grid=(b, nh),
            in_specs=[spec, spec, spec],
            out_specs=spec),
        compiler_params=pltpu.CompilerParams(
            dimension_semantics=("parallel", "parallel")),
    )(q, k, v)


def gru_core(xr, xz, xn, p):
    b, s, h = xr.shape
    xspec = pl.BlockSpec((None, s, h), lambda i: (i, 0, 0))
    wspec = pl.BlockSpec((h, h), lambda i: (0, 0))
    bspec = pl.BlockSpec((1, h), lambda i: (0, 0))
    return pl.pallas_call(
        _gru_kernel,
        out_shape=jax.ShapeDtypeStruct((b, s, h), jnp.float32),
        grid_spec=pltpu.PrefetchScalarGridSpec(
            num_scalar_prefetch=0,
            grid=(b,),
            in_specs=[xspec, xspec, xspec,
                      wspec, wspec, wspec,
                      bspec, bspec, bspec],
            out_specs=xspec,
            scratch_shapes=[pltpu.VMEM((1, h), jnp.float32)]),
        compiler_params=pltpu.CompilerParams(dimension_semantics=("parallel",)),
    )(xr, xz, xn, p["whr"], p["whz"], p["whn"], p["bhr"], p["bhz"], p["bhn"])


# ----------------------------------------------------------------------------
# Composite modules (PyTorch -> Pallas+glue)
# ----------------------------------------------------------------------------
def gru(x, layers, hidden):
    """Bidirectional multi-layer GRU, inference (input proj in Pallas dense,
    recurrence fully inside the Pallas GRU kernel)."""
    for layer in layers:
        outs = []
        for direction in ("fwd", "bwd"):
            p = layer[direction]
            xd = x if direction == "fwd" else x[:, ::-1, :]
            xp = dense(xd, {"w": p["wi"], "b": p["bi"]})        # (B, S, 3H)
            xr = xp[..., :hidden]
            xz = xp[..., hidden:2 * hidden]
            xn = xp[..., 2 * hidden:]
            hs = gru_core(xr, xz, xn, p)
            if direction == "bwd":
                hs = hs[:, ::-1, :]
            outs.append(hs)
        x = jnp.concatenate(outs, axis=-1)
    return x


def multi_head_attention(x, p, nhead):
    b, s, d = x.shape
    dh = d // nhead
    qkv = dense(x, p["in_proj"])                                # (b, s, 3d)
    qkv = qkv.reshape(b, s, 3, nhead, dh)
    q = jnp.transpose(qkv[:, :, 0], (0, 2, 1, 3))
    k = jnp.transpose(qkv[:, :, 1], (0, 2, 1, 3))
    v = jnp.transpose(qkv[:, :, 2], (0, 2, 1, 3))
    ctx = attention_core(q, k, v)                               # (b, nh, s, dh)
    ctx = jnp.transpose(ctx, (0, 2, 1, 3)).reshape(b, s, d)
    return dense(ctx, p["out_proj"])


def transformer_encoder_layer(x, p, nhead):
    # nn.TransformerEncoderLayer, post-norm, relu FFN, inference (dropout=id)
    a = multi_head_attention(x, p["attn"], nhead)
    x = layer_norm(x + a, p["ln1"])
    h = dense(x, p["ff1"], act="relu")
    h = dense(h, p["ff2"])
    return layer_norm(x + h, p["ln2"])


def simple_transformer(x, p):
    for lp in p["layers"]:
        x = positional_encode(x, lp["pe"], lp["d_model"])
        x = transformer_encoder_layer(x, lp["enc"], lp["nhead"])
        # Sequential(..., Mish, Dropout, Linear(h, h_new), Mish): mish fused as
        # pre-activation of the projection, dropout is identity at inference.
        x = dense(x, lp["proj"], act="mish", pre_act="mish")
        x = layer_norm(x, lp["ln"])
    return dense(x, p["out"])                                   # out_net


def reparameterize(key, mu, logvar):
    eps = jax.random.normal(key, mu.shape, dtype=mu.dtype)
    return mu + eps * jnp.exp(0.5 * logvar)


def embedding_net(ids_f, p, key):
    """EmbeddingNet.forward (inference path): masked-equivalent formulation —
    compute the embedding for every position and zero out ids <= -1."""
    valid = ids_f > -1
    safe = jnp.clip(ids_f, 0, p["table"].shape[0] - 1).astype(jnp.int32)
    e = jnp.take(p["table"], safe, axis=0)
    h = dense(e, p["l1"], act="mish")
    h = dense(h, p["l2"], act="mish")
    mu = dense(h, p["mu"])
    logvar = dense(h, p["lv"])
    z = reparameterize(key, mu, logvar)
    return jnp.where(valid[:, None], z, 0.0)


def get_divider(dim, max_heads=12):
    mret = 1
    for i in range(1, max_heads + 1):
        if dim % i == 0:
            mret = i
    return mret


def build_pe(max_seq_len, d_model):
    pe = np.zeros((max_seq_len, d_model), np.float32)
    for pos in range(max_seq_len):
        for i in range(0, d_model - 1, 2):
            pe[pos, i] = math.sin(pos / 10000 ** (2 * i / d_model))
            pe[pos, i + 1] = math.cos(pos / 10000 ** (2 * (i + 1) / d_model))
    return jnp.asarray(pe)


# ----------------------------------------------------------------------------
# Parameters
# ----------------------------------------------------------------------------
ANNO_SIZES = [20, 1, 6, 6, 9, 9, 14, 14, 14, 21, 21, 7, 7, 6, 6, 15, 15]


class ParamGen:
    def __init__(self, key):
        self._key = key

    def _next(self):
        self._key, k = jax.random.split(self._key)
        return k

    def w(self, i, o):
        return jax.random.normal(self._next(), (i, o), jnp.float32) / math.sqrt(max(i, 1))

    def b(self, o):
        return jnp.zeros((1, o), jnp.float32)

    def dense(self, i, o):
        return {"w": self.w(i, o), "b": self.b(o)}

    def ln(self, f):
        return {"g": jnp.ones((1, f), jnp.float32), "b": jnp.zeros((1, f), jnp.float32)}

    def table(self, n, d):
        return jax.random.normal(self._next(), (n, d), jnp.float32) * 0.1

    def gru(self, in_dim, hidden, num_layers):
        layers = []
        d = in_dim
        for _ in range(num_layers):
            layer = {}
            for direction in ("fwd", "bwd"):
                layer[direction] = {
                    "wi": self.w(d, 3 * hidden), "bi": self.b(3 * hidden),
                    "whr": self.w(hidden, hidden), "whz": self.w(hidden, hidden),
                    "whn": self.w(hidden, hidden),
                    "bhr": self.b(hidden), "bhz": self.b(hidden), "bhn": self.b(hidden)}
            layers.append(layer)
            d = 2 * hidden
        return layers

    def encoder_layer(self, d, ff=2048):
        return {"attn": {"in_proj": self.dense(d, 3 * d), "out_proj": self.dense(d, d)},
                "ln1": self.ln(d),
                "ff1": self.dense(d, ff), "ff2": self.dense(ff, d),
                "ln2": self.ln(d)}

    def simple_transformer(self, in_features, hidden, num_layers, max_heads=8, max_seq=34):
        layers = []
        h = in_features
        for _ in range(num_layers):
            h_new = max(h // 2, hidden)
            layers.append({"d_model": h,
                           "pe": build_pe(max_seq, h),
                           "nhead": get_divider(h, max_heads),
                           "enc": self.encoder_layer(h),
                           "proj": self.dense(h, h_new),
                           "ln": self.ln(h_new)})
            h = h_new
        return {"layers": layers, "out": self.dense(h, hidden)}


def make_params(key, cfg):
    pg = ParamGen(key)
    H, Z, T = cfg["hidden"], cfg["z_size"], cfg["time_step"]
    p = {}
    # speaker embedding
    p["spk_table"] = pg.table(3329, Z)
    p["spk_l1"] = pg.dense(Z, Z)
    p["spk_l2"] = pg.dense(Z, Z)
    p["spk_mu"] = pg.dense(Z, Z)
    p["spk_lv"] = pg.dense(Z, Z)
    # pose code embedding GRU
    p["pose_table"] = pg.table(512, 128)
    p["pose_gru"] = pg.gru(128, 17, 1)
    # annotation GRU
    p["anno_gru"] = pg.gru(188, 16, 1)
    # audio VQ feature MLPs
    p["audio_b1"] = pg.dense(2304, H)
    p["audio_b2"] = pg.dense(H, 64 * T)
    p["audio_t1"] = pg.dense(576, H)
    p["audio_t2"] = pg.dense(H, 64 * T)
    p["audio_norm"] = pg.ln(64)
    # Wav2Vec2 GRU + norm
    p["w2v_gru"] = pg.gru(113, 17, 1)
    p["w2v_norm"] = pg.ln(34)
    # annotation embedding nets
    p["anno_emb"] = []
    for a_s in ANNO_SIZES:
        if a_s == 1:
            p["anno_emb"].append({"lin": pg.dense(1, Z)})
        else:
            p["anno_emb"].append({"table": pg.table(a_s, Z),
                                  "l1": pg.dense(Z, Z), "l2": pg.dense(Z, Z),
                                  "mu": pg.dense(Z, Z), "lv": pg.dense(Z, Z)})
    p["emb_cond1"] = pg.dense(Z * len(ANNO_SIZES), 2 * Z)
    p["emb_cond2"] = pg.dense(2 * Z, 2 * Z)
    # beat branches
    p["squ1"] = pg.dense(3 * cfg["side_size"], H)
    p["squ2"] = pg.dense(H, H)
    p["oenv1"] = pg.dense(3 * cfg["side_size"], H)
    p["oenv2"] = pg.dense(H, H)
    # pose embedding
    p["pose1"] = pg.dense(160, H)
    p["pose2"] = pg.dense(H, 64)
    # fused-context trunk
    d_cat = (64 + H + 64 + cfg["audio_T"] + cfg["text_feat"] + cfg["n_pose_ids"]
             + Z + 2 * Z + 32 * cfg["n_anno_steps"])
    p["gru_ln"] = pg.ln(d_cat)
    p["transformer_1"] = pg.simple_transformer(d_cat, H, 2)
    p["transformer_2"] = pg.simple_transformer(H, H, 5)
    p["gru_1"] = pg.gru(d_cat, H, 1)
    p["gru_2"] = pg.gru(2 * H, H, 4)
    d_fin = 4 * H + 64 + cfg["audio_T"] + cfg["text_feat"]
    p["gru_out_norm"] = pg.ln(d_fin)
    p["out_emb1"] = pg.dense(d_fin, 2 * H)
    p["out_emb2a"] = pg.dense(2 * H, H)
    p["out_emb2b"] = pg.dense(H, H)
    # speaker-id auxiliary head
    p["z_arc1"] = pg.dense(T * H, H)
    p["z_arc_ln"] = pg.ln(H)
    p["z_arc2"] = pg.dense(H, 3329)
    p["z_emb_table"] = pg.table(3329, Z)
    # temporal aligner
    p["beat_out1"] = pg.dense(2 * H, H)
    p["beat_out2"] = pg.dense(H, 159)
    p["ta_norm"] = pg.ln(159 * 5 + Z)
    p["ta1"] = pg.dense(159 * 5 + Z, H)
    p["ta2"] = pg.dense(H, H)
    p["ta3"] = pg.dense(H, H)
    p["ta_out_norm"] = pg.ln(H + 159)
    p["ta4"] = pg.dense(H + 159, 400)
    p["ta5"] = pg.dense(400, 159)
    return p


# ----------------------------------------------------------------------------
# Full forward pass
# ----------------------------------------------------------------------------
def aqgt_plus_forward(params, cfg, key, pre_seq, beats, in_text, in_audio,
                      audio_var_bottom, audio_var_top, vid_indices, annotation):
    H, Z, T = cfg["hidden"], cfg["z_size"], cfg["time_step"]
    side = cfg["side_size"]
    B = pre_seq.shape[0]
    keys = jax.random.split(key, 2 + len(ANNO_SIZES))

    # ---- speaker identity embedding + reparameterisation ----------------------
    z = jnp.take(params["spk_table"], vid_indices, axis=0)
    z = dense(z, params["spk_l1"], act="mish")
    z = dense(z, params["spk_l2"])
    z_mu = dense(z, params["spk_mu"])
    z_logvar = dense(z, params["spk_lv"])
    z_context = reparameterize(keys[0], z_mu, z_logvar)

    # ---- pose VQ codes + learned code embedding --------------------------------
    # TODO(synk): seq_pose_encoder.forward_extra (frozen pretrained VQ-VAE loaded
    # from disk) has no weights available; its discrete codes are stubbed with 0s.
    ids = jnp.zeros((B, cfg["n_pose_ids"]), jnp.int32)
    quant_pose = jnp.take(params["pose_table"], ids, axis=0)          # (B, L, 128)
    quant_pose = gru(quant_pose, params["pose_gru"], 17)              # (B, L, 34)
    quant_pose = jnp.transpose(quant_pose, (0, 2, 1))                 # (B, 34, L)

    # TODO(synk): Annotation_model.inference (frozen pretrained) stubbed with 0s.
    anno_feat = jnp.zeros((B, cfg["n_anno_steps"], 188), jnp.float32)
    anno_cat = gru(anno_feat, params["anno_gru"], 16)                 # (B, La, 32)
    anno_cat = jnp.tile(anno_cat.reshape(B, 1, -1), (1, T, 1))

    # TODO(synk): TextEncoderTCN (pretrained word embeddings) stubbed with 0s.
    text_feat_seq = jnp.tile(jnp.zeros((B, 1, cfg["text_feat"]), jnp.float32), (1, T, 1))

    # ---- audio VQ features ------------------------------------------------------
    avb = dense(audio_var_bottom, params["audio_b1"], act="mish")
    avb = dense(avb, params["audio_b2"], act="mish")
    avt = dense(audio_var_top, params["audio_t1"], act="mish")
    avt = dense(avt, params["audio_t2"], act="mish")
    audio_comb = (avb + avt).reshape(B, T, 64)
    audio_comb = layer_norm(audio_comb, params["audio_norm"], pre_act="mish")

    # ---- Wav2Vec2 stream --------------------------------------------------------
    audio_seq = jnp.transpose(jnp.squeeze(in_audio, axis=1), (0, 2, 1))  # (B, Ta, 113)
    log = gru(audio_seq, params["w2v_gru"], 17)                          # (B, Ta, 34)
    audio_log = layer_norm(log, params["w2v_norm"], pre_act="mish")
    audio_log = jnp.transpose(audio_log, (0, 2, 1))                      # (B, 34, Ta)

    # ---- annotation embeddings --------------------------------------------------
    c1 = []
    for i in range(len(ANNO_SIZES)):
        anno_f = annotation[:, i, :].reshape(B * T)
        if i == 1:
            out_i = dense(anno_f[:, None], params["anno_emb"][i]["lin"], act="mish")
        else:
            out_i = embedding_net(anno_f, params["anno_emb"][i], keys[2 + i])
        c1.append(out_i.reshape(B, T, Z))
    c1 = jnp.concatenate(c1, axis=2)
    anno_z = dense(c1, params["emb_cond1"], act="mish")
    anno_z = dense(anno_z, params["emb_cond2"])

    # ---- beat windows -----------------------------------------------------------
    padded = jnp.concatenate([jnp.zeros((B, 2, side), jnp.float32), beats,
                              jnp.zeros((B, 2, side), jnp.float32)], axis=2)
    sub_b = jnp.stack([padded[:, :, side * ts: side * ts + 3 * side] for ts in range(T)],
                      axis=1)                                            # (B, 34, 2, 90)
    squ = dense(sub_b[:, :, 0, :], params["squ1"], act="mish")
    squ = dense(squ, params["squ2"], act="mish")
    oenv = dense(sub_b[:, :, 1, :], params["oenv1"], act="mish")
    oenv = dense(oenv, params["oenv2"], act="mish")
    sum_out = squ + oenv

    # ---- pose embedding ---------------------------------------------------------
    pose_out = dense(pre_seq, params["pose1"], act="mish")
    pose_out = dense(pose_out, params["pose2"], act="mish")

    # ---- fused context ----------------------------------------------------------
    z_rep = jnp.tile(z_context[:, None, :], (1, T, 1))
    cat_out = jnp.concatenate([pose_out, sum_out, audio_comb, audio_log, text_feat_seq,
                               quant_pose, z_rep, anno_z, anno_cat], axis=2)
    cat_out = layer_norm(cat_out, params["gru_ln"])

    # ---- dual transformer / GRU trunk -------------------------------------------
    output = simple_transformer(cat_out, params["transformer_1"])
    output_1 = mish(output)

    output_gru = gru(cat_out, params["gru_1"], H)
    output_gru = mish(output_gru[..., :H] + output_gru[..., H:])

    output = simple_transformer(output_1, params["transformer_2"])
    output_2 = mish(output)

    output = gru(jnp.concatenate([output_gru, output_2], axis=2), params["gru_2"], H)
    output = mish(output[..., :H] + output[..., H:])

    output_fin = jnp.concatenate([output, output_1, output_2, output_gru,
                                  audio_comb, audio_log, text_feat_seq], axis=2)
    output_fin = layer_norm(output_fin, params["gru_out_norm"])
    feat_out = dense(output_fin, params["out_emb1"], act="mish")
    feat_out = dense(feat_out, params["out_emb2a"], act="mish")
    feat_out = dense(feat_out, params["out_emb2b"], act="mish")          # (B, 34, H)

    # ---- speaker-id auxiliary head ----------------------------------------------
    arc_h = dense(feat_out.reshape(B, T * H), params["z_arc1"], act="mish")
    arc_h = layer_norm(arc_h, params["z_arc_ln"])
    arc_out = dense(arc_h, params["z_arc2"], act="softmax")              # (B, 3329)
    # F.cross_entropy applied to softmax probabilities (quirk kept from reference)
    arc_loss = jnp.mean(jax.nn.logsumexp(arc_out, axis=1)
                        - jnp.take_along_axis(arc_out, vid_indices[:, None], axis=1)[:, 0])
    arc_emb = jnp.take(params["z_emb_table"], jnp.argmax(arc_out, axis=1), axis=0)
    arc_emb = jnp.tile(arc_emb[:, None, :], (1, T, 1))

    # ---- temporal aligner ---------------------------------------------------------
    # TODO(synk): seq_pose_encoder.decode (frozen pretrained VQ-VAE decoder) is
    # untranslatable; its decoded-pose feedback ret[ts-k] is stubbed with zeros,
    # which removes the only cross-step dependency so all 34 steps run batched.
    last_feat = jnp.concatenate([jnp.zeros((B, 1, H), jnp.float32),
                                 feat_out[:, :-1, :]], axis=1)
    beat_in = jnp.concatenate([feat_out, last_feat], axis=2)             # (B, 34, 2H)
    beat_fin = dense(beat_in, params["beat_out1"], act="mish", pre_act="mish")
    beat_fin = dense(beat_fin, params["beat_out2"])                      # (B, 34, 159)

    prev_pose_feedback = jnp.zeros((B, T, 4 * 159), jnp.float32)         # TODO(synk): VQ-VAE decode
    g1 = jnp.concatenate([prev_pose_feedback, beat_fin, arc_emb], axis=2)
    g1 = layer_norm(g1, params["ta_norm"])
    tt = dense(g1, params["ta1"], act="mish", pre_act="mish")
    tt = dense(tt, params["ta2"], act="mish")
    tt = dense(tt, params["ta3"])
    g2 = layer_norm(jnp.concatenate([tt, beat_fin], axis=2), params["ta_out_norm"])
    tt4 = dense(g2, params["ta4"], pre_act="mish")                       # (B, 34, 400)
    ret2 = dense(tt4, params["ta5"], act="tanh")                         # (B, 34, 159)

    # decoded poses from the (stubbed) VQ-VAE decoder, blended as in the reference
    dec_stack = jnp.zeros((B, T, 4, 159), jnp.float32)                   # TODO(synk): VQ-VAE decode
    prev2 = jnp.concatenate([jnp.zeros((B, 1, 159), jnp.float32),
                             dec_stack[:, :-1, 2, :]], axis=1)
    cur1 = dec_stack[:, :, 1, :]
    nxt0 = jnp.concatenate([dec_stack[:, 1:, 0, :],
                            jnp.zeros((B, 1, 159), jnp.float32)], axis=1)
    denom = jnp.concatenate([jnp.full((1,), 2.0, jnp.float32),
                             jnp.full((T - 2,), 3.0, jnp.float32),
                             jnp.full((1,), 2.0, jnp.float32)])
    out = (prev2 + cur1 + nxt0) / denom[None, :, None] + ret2

    return out, z_context, z_mu, z_logvar, arc_loss


# ----------------------------------------------------------------------------
# Demo / smoke test
# ----------------------------------------------------------------------------
if __name__ == "__main__":
    cfg = {
        "hidden": 32,        # args.hidden_size (small demo value)
        "z_size": 16,
        "time_step": 34,
        "side_size": 30,
        "audio_T": 32,       # Wav2Vec2 feature frames
        "text_feat": 32,     # stubbed TextEncoderTCN feature width
        "n_pose_ids": 12,    # stubbed VQ-VAE code-sequence length
        "n_anno_steps": 1,   # stubbed Annotation_model sequence length
    }
    B, T = 2, cfg["time_step"]

    root = jax.random.PRNGKey(0)
    (k_pre, k_beat, k_aud, k_avb, k_avt,
     k_vid, k_anno, k_par, k_fwd) = jax.random.split(root, 9)

    pre_seq = jax.random.normal(k_pre, (B, T, 160), jnp.float32)
    beats = jax.random.normal(k_beat, (B, 2, cfg["side_size"] * T), jnp.float32)
    in_text = jnp.zeros((B, 8), jnp.int32)   # unused: text encoder is pretrained/frozen
    in_audio = jax.random.normal(k_aud, (B, 1, 113, cfg["audio_T"]), jnp.float32)
    audio_var_bottom = jax.random.normal(k_avb, (B, 2304), jnp.float32)
    audio_var_top = jax.random.normal(k_avt, (B, 576), jnp.float32)
    vid_indices = jax.random.randint(k_vid, (B,), 0, 3329)
    annotation = jax.random.randint(k_anno, (B, 17, T), -1, 6).astype(jnp.float32)

    params = make_params(k_par, cfg)

    out, z_context, z_mu, z_logvar, arc_loss = aqgt_plus_forward(
        params, cfg, k_fwd, pre_seq, beats, in_text, in_audio,
        audio_var_bottom, audio_var_top, vid_indices, annotation)

    out = jax.block_until_ready(out)
    assert out.shape == (B, T, 159), out.shape
    assert z_context.shape == (B, cfg["z_size"])
    assert z_mu.shape == (B, cfg["z_size"]) and z_logvar.shape == (B, cfg["z_size"])
    assert bool(jnp.isfinite(out).all())
    assert bool(jnp.isfinite(arc_loss))
    print("KERNEL_OK")
</pallas_src>

<mosaic_0001>
module attributes {stable_mosaic.version = 11 : i64} {
  func.func @_dense_kernel(%arg0: i32, %arg1: memref<2x16xf32, #tpu.memory_space<vmem>>, %arg2: memref<16x16xf32, #tpu.memory_space<vmem>>, %arg3: memref<1x16xf32, #tpu.memory_space<vmem>>, %arg4: memref<2x16xf32, #tpu.memory_space<vmem>>) attributes {dimension_semantics = [#tpu.dimension_semantics<parallel>], iteration_bounds = array<i64: 1>, scalar_prefetch = 0 : i64, scratch_operands = 0 : i64, tpu.core_type = #tpu.core_type<tc>, window_params = [{transform_indices = @transform_0, window_bounds = array<i64: 2, 16>}, {pipeline_mode = #tpu.pipeline_mode<synchronous>, transform_indices = @transform_1, window_bounds = array<i64: 16, 16>}, {pipeline_mode = #tpu.pipeline_mode<synchronous>, transform_indices = @transform_2, window_bounds = array<i64: 1, 16>}, {transform_indices = @transform_3, window_bounds = array<i64: 2, 16>}]} {
    %c0 = arith.constant 0 : index
    %c0_0 = arith.constant 0 : index
    %0 = vector.load %arg1[%c0, %c0_0] : memref<2x16xf32, #tpu.memory_space<vmem>>, vector<2x16xf32>
    %c0_1 = arith.constant 0 : index
    %c0_2 = arith.constant 0 : index
    %1 = vector.load %arg2[%c0_1, %c0_2] : memref<16x16xf32, #tpu.memory_space<vmem>>, vector<16x16xf32>
    %cst = arith.constant dense<0.000000e+00> : vector<2x16xf32>
    %2 = tpu.matmul %0, %1, %cst {dimension_numbers = #tpu.dot_dimension_numbers<[1], [0], [0], [1], [0, 0, 1, 1], [], []>} : vector<2x16xf32>, vector<16x16xf32>, vector<2x16xf32> -> vector<2x16xf32>
    %c0_3 = arith.constant 0 : index
    %c0_4 = arith.constant 0 : index
    %3 = vector.load %arg3[%c0_3, %c0_4] : memref<1x16xf32, #tpu.memory_space<vmem>>, vector<1x16xf32>
    %4 = vector.broadcast %3 : vector<1x16xf32> to vector<2x16xf32>
    %5 = arith.addf %2, %4 : vector<2x16xf32>
    %cst_5 = arith.constant 0.000000e+00 : f32
    %6 = vector.broadcast %cst_5 : f32 to vector<2x16xf32>
    %7 = arith.maximumf %5, %6 : vector<2x16xf32>
    %8 = math.absf %5 : vector<2x16xf32>
    %cst_6 = arith.constant 0.000000e+00 : f32
    %9 = vector.broadcast %cst_6 : f32 to vector<2x16xf32>
    %10 = arith.subf %9, %8 : vector<2x16xf32>
    %11 = math.exp %10 : vector<2x16xf32>
    %cst_7 = arith.constant 1.000000e+00 : f32
    %12 = vector.broadcast %cst_7 : f32 to vector<2x16xf32>
    %13 = arith.addf %12, %11 : vector<2x16xf32>
    %14 = math.log %13 : vector<2x16xf32>
    %15 = arith.addf %7, %14 : vector<2x16xf32>
    %16 = math.tanh %15 : vector<2x16xf32>
    %17 = arith.mulf %5, %16 : vector<2x16xf32>
    %c0_8 = arith.constant 0 : index
    %c0_9 = arith.constant 0 : index
    %18 = vector.load %arg4[%c0_8, %c0_9] : memref<2x16xf32, #tpu.memory_space<vmem>>, vector<2x16xf32>
    tpu.vector_store %arg4[%c0_8, %c0_9], %17 {strides = array<i32>} : memref<2x16xf32, #tpu.memory_space<vmem>>, vector<2x16xf32>,
    return
  }
  func.func @transform_0(%arg0: i32) -> (i32, i32) {
    %c0_i32 = arith.constant 0 : i32
    %c0_i32_0 = arith.constant 0 : i32
    return %arg0, %c0_i32 : i32, i32
  }
  func.func @transform_1(%arg0: i32) -> (i32, i32) {
    %c0_i32 = arith.constant 0 : i32
    %c0_i32_0 = arith.constant 0 : i32
    %c0_i32_1 = arith.constant 0 : i32
    return %c0_i32, %c0_i32_0 : i32, i32
  }
  func.func @transform_2(%arg0: i32) -> (i32, i32) {
    %c0_i32 = arith.constant 0 : i32
    %c0_i32_0 = arith.constant 0 : i32
    %c0_i32_1 = arith.constant 0 : i32
    return %c0_i32, %c0_i32_0 : i32, i32
  }
  func.func @transform_3(%arg0: i32) -> (i32, i32) {
    %c0_i32 = arith.constant 0 : i32
    %c0_i32_0 = arith.constant 0 : i32
    return %arg0, %c0_i32 : i32, i32
  }
}

</mosaic_0001>

<bundles_post_ra>
// kernel: tpu_custom_call.1
= control target key start
LH: loop header
LB: loop body
LE: loop exit
PB: predicated region body
PF: predicated region fallthrough
CT: control target
= control target key end

     0   :  { %8 = vsyncpa [#allocation3], 0  ;;  %s284_s0 = inlined_call_operand.hbm [shape: f32[2,16], index: 0, kind: input, shape index: {}]   ;;  %s285_s1 = inlined_call_operand.hbm [shape: f32[16,16], index: 1, kind: input, shape index: {}]   ;;  %s286_s2 = inlined_call_operand.vmem [shape: f32[1,16], index: 2, kind: input, shape index: {}]   ;;  %s287_s3 = inlined_call_operand.hbm [shape: f32[2,16], index: 3, kind: output, shape index: {}]  }
   0x1   :  { %9 = vsyncpa [#allocation6], 0 }
   0x2   :  { %10 = vsyncpa [#allocation4], 0  ;;  %s245_s12 = smov [#allocation2]   ;;  %s246_s14 = smov [#allocation5]  }
   0x3   :  { %s17_s13 = sshll.u32 %s245_s12, 4  ;;  %s26_s15 = sshll.u32 %s246_s14, 4  ;;  %s18_s13 = int_to_ptr.vmem [resolvable:$true] %s17_s13  ;;  %s27_s15 = int_to_ptr.vmem [resolvable:$true] %s26_s15 }
   0x4   :  { %s187_s16 = scalar_lea.vmem %s18_s13, 32  ;;  %p192_p1 = scmp.lt.s32.totalorder %s18_s13, %s18_s13 }
   0x5   :  { %p188_p0 = scmp.ne.s32.totalorder %s18_s13, %s187_s16  ;;  %p193_p2 = scmp.lt.s32.totalorder %s187_s16, %s187_s16 }
   0x7   :  { %p194_p3 = por %p193_p2, %p192_p1 }
   0x9   :  { %p195_p4 = pnand %p194_p3, %p188_p0 }
   0xb   :  { %198 = shalt.err (!%p195_p4)
}
   0xc   :  { %20 = dma.hbm_to_vmem [thread:$0]  %s284_s0, 32, %s18_s13, [#allocation3]  }
   0xd   :  { %s207_s19 = scalar_lea.vmem %s27_s15, 256  ;;  %p212_p6 = scmp.lt.s32.totalorder %s27_s15, %s27_s15 }
   0xe   :  { %p208_p5 = scmp.ne.s32.totalorder %s27_s15, %s207_s19  ;;  %p213_p7 = scmp.lt.s32.totalorder %s207_s19, %s207_s19 }
  0x10   :  { %p214_p8 = por %p213_p7, %p212_p6 }
  0x12   :  { %p215_p9 = pnand %p214_p8, %p208_p5 }
  0x14   :  { %218 = shalt.err (!%p215_p9)
}
  0x15   :  { %s247_s20 = smov 128   ;;  %s248_s21 = smov 8  }
  0x16   :  { %32 = dma.hbm_to_vmem [thread:$0]  %s285_s1, 256, %s27_s15, [#allocation6], %s247_s20, %s247_s20, %s248_s21  }
  0x17   :  { %239 = dma.done.wait [#allocation3], 32  }
  0x18   :  { %240 = vsyncadd [#allocation3], 4294967264 }
  0x19   :  { %241 = dma.done.wait [#allocation6], 256  }
  0x1a   :  { %242 = vsyncadd [#allocation6], 4294967040  ;;  %v249_v0 = vmov 0.0   ;;  %vm250_vm0 = vmmov 0   ;;  %v43_v1 = vld [vmem:[#allocation5 + $0x8] sm:$0xff]  ;;  %v42_v2 = vld [vmem:[#allocation5] sm:$0xff] }
  0x1b   :  { %159 = vmatprep.subr.mxu0 %v249_v0  ;;  %163 = vmatprep.mubr.msk.f32.mxu0 %vm250_vm0, %v249_v0  ;;  %v41_v3 = vld [vmem:[#allocation2] sm:$0x3]  ;;  %vm51_vm1 = vcmask 130048   ;;  %s251_s1 = smov [#allocation7]   ;;  %vm136_vm2 = vcmask 123904  }
  0x1c   :  { %160 = vmatpush3.msra.mxu0 %v43_v1  ;;  %v154_v4 = vld [vmem:[%s286_s2] ss:$0 sm:$0xff]  ;;  %s144_s25 = sshll.u32 %s251_s1, 4  ;;  %s145_s25 = int_to_ptr.vmem [resolvable:$true] %s144_s25 }
  0x1d   :  { %161 = vmatprep.subr.mxu0 %v249_v0  ;;  %s219_s2 = scalar_lea.vmem %s145_s25, 32  ;;  %p224_p11 = scmp.lt.s32.totalorder %s145_s25, %s145_s25 }
  0x1e   :  { %162 = vmatpush3.msra.mxu0 %v42_v2  ;;  %p220_p10 = scmp.ne.s32.totalorder %s145_s25, %s219_s2  ;;  %p225_p12 = scmp.lt.s32.totalorder %s219_s2, %s219_s2 }
  0x1f   :  { %164 = vmatmul.mubr.msk.f32.vlgmr.msra.gmra.mxu0 %vm51_vm1, %v41_v3 }
  0x20   :  { %p226_p13 = por %p225_p12, %p224_p11 }
  0x22   :  { %p227_p0 = pnand %p226_p13, %p220_p10 }
  0xdf   :  { %v121_v5 = vpop.f32.mrf.mxu0 }
  0xe0   :  { %v122_v6 = vadd.f32 %v154_v4, %v121_v5 }
  0xe1   :  { %v165_v7 = vpop.f32.mrf.mxu0 }
  0xe2   :  { %v126_v8 = vand.u32 2147483647, %v122_v6  ;;  %v125_v14 = vmax.f32 %v122_v6, 0.0 }
  0xe4   :  { %v127_v9 = vsub.f32 0.0, %v126_v8 }
  0xe6   :  { %v128_v10 = vmul.f32 1.442695, %v127_v9 }
  0xe8   :  { %173 = vpow2.f32 %v128_v10 }
  0xf5   :  { %v174_v11 = vpop.eup %173 }
  0xf6   :  { %v130_v12 = vadd.f32 1.0, %v174_v11 }
  0xf8   :  { %175 = vlog2.f32 %v130_v12 }
 0x105   :  { %v176_v13 = vpop.eup %175 }
 0x106   :  { %v132_v15 = vmul.f32 0.6931472, %v176_v13 }
 0x108   :  { %v133_v16 = vadd.f32 %v132_v15, %v125_v14 }
 0x10a   :  { %177 = vtanh.f32 %v133_v16 }
 0x117   :  { %v178_v17 = vpop.eup %177 }
 0x118   :  { %v135_v18 = vmul.f32 %v178_v17, %v122_v6 }
 0x11a   :  { %137 = vst.msk [vmem:[#allocation7] sm:$0x3] %vm136_vm2, %v135_v18 }
 0x11b   :  { %230 = shalt.err (!%p227_p0)
}
 0x11c   :  { %147 = dma.vmem_to_hbm [thread:$0]  %s145_s25, 32, %s287_s3, [#allocation4]  }
 0x11d   :  { %243 = dma.done.wait [#allocation4], 32  }
 0x11e   :  { %244 = vsyncadd [#allocation4], 4294967264 }
 0x11f   :  { %151 = vsyncpa [#allocation3], 1 }
 0x120   :  { %152 = vsyncpa [#allocation6], 1 }
 0x121   :  { %153 = vsyncpa [#allocation4], 1 }

</bundles_post_ra>
